<compile_context>
chip_gen: v7x
topology: tpu7x:2x2x1
jax: 0.10.0
libtpu: 0.0.40
codegen_flags: <defaults>
</compile_context>

<pallas_src>
import functools
import math

import jax
import jax.numpy as jnp
from jax import lax
from jax.experimental import pallas as pl
from jax.experimental.pallas import tpu as pltpu


def _rel_pos_bias_kernel(emb_t_ref, out_ref, *, n, num_buckets, max_distance, tile):
    """emb_t_ref: (heads, num_buckets) resident table; out_ref: (heads, tile)."""
    base = pl.program_id(0) * tile

    # Flat (i*n + j) positions handled by this tile, laid out along lanes.
    flat = lax.broadcasted_iota(jnp.int32, (1, tile), 1) + base          # (1, tile)

    # i = flat // n without vector integer division: f32 reciprocal estimate
    # plus one exact correction step (valid while n*n < 2**24).
    i_approx = (flat.astype(jnp.float32) * (1.0 / n)).astype(jnp.int32)
    r = flat - i_approx * n
    i_idx = i_approx + jnp.where(r < 0, -1, 0) + jnp.where(r >= n, 1, 0)
    j_idx = flat - i_idx * n

    # torch: rel_pos = j - i; the bucket formula runs on neg = -rel_pos = i - j.
    neg = i_idx - j_idx

    half = num_buckets // 2
    max_exact = half // 2

    ret = jnp.where(neg < 0, half, 0)
    n_abs = jnp.abs(neg)
    is_small = n_abs < max_exact

    # Folded constants: val_if_large = max_exact + trunc(log(d / max_exact) * scale)
    inv_max_exact = 1.0 / float(max_exact)            # max_exact is a power of two
    scale = float(half - max_exact) / math.log(max_distance / max_exact)
    n_safe = jnp.maximum(n_abs, 1).astype(jnp.float32)   # guard log(0); lanes masked
    val_if_large = max_exact + (
        jnp.log(n_safe * inv_max_exact) * scale
    ).astype(jnp.int32)                               # trunc == torch .long() here
    val_if_large = jnp.minimum(val_if_large, half - 1)

    bucket = ret + jnp.where(is_small, n_abs, val_if_large)              # (1, tile)

    # Embedding gather as a one-hot matmul on the MXU, already (heads, tile).
    onehot = (
        bucket == lax.broadcasted_iota(jnp.int32, (num_buckets, tile), 0)
    ).astype(jnp.float32)                                                # (nb, tile)
    vals = jnp.dot(emb_t_ref[...], onehot, preferred_element_type=jnp.float32)
    out_ref[...] = vals.astype(out_ref.dtype)


def relative_position_bias(emb, n, *, num_buckets=32, max_distance=128, tile=1024):
    """emb: (num_buckets, heads) embedding table. Returns (heads, n, n)."""
    nb_total, heads = emb.shape
    assert nb_total == num_buckets
    assert num_buckets >= 4, "bucket formula needs max_exact >= 1"
    assert tile % 128 == 0, "tile must be lane-aligned (multiple of 128)"
    # TODO(synk): for n > 4096 (n*n >= 2**24) switch the flat->(i,j) recovery to a
    # row-tiled variant; the f32-reciprocal trick needs flat indices exact in f32.
    assert n <= 4096

    total = n * n
    num_tiles = pl.cdiv(total, tile)
    padded = num_tiles * tile

    emb_t = emb.T  # tiny (heads, num_buckets) one-time glue; stays VMEM-resident

    kernel = functools.partial(
        _rel_pos_bias_kernel,
        n=n, num_buckets=num_buckets, max_distance=max_distance, tile=tile,
    )
    flat = pl.pallas_call(
        kernel,
        grid=(num_tiles,),
        in_specs=[pl.BlockSpec((heads, num_buckets), lambda g: (0, 0))],
        out_specs=pl.BlockSpec((heads, tile), lambda g: (0, g)),
        out_shape=jax.ShapeDtypeStruct((heads, padded), emb.dtype),
        compiler_params=pltpu.CompilerParams(
            dimension_semantics=("parallel",),
        ),
    )(emb_t)

    if padded != total:          # drop garbage columns of the padded last tile
        flat = flat[:, :total]
    return flat.reshape(heads, n, n)   # contiguous reshape only -- no transpose


def _reference(emb, n, num_buckets=32, max_distance=128):
    """Plain-JAX reference mirroring the torch module expression-for-expression."""
    q = jnp.arange(n)
    k = jnp.arange(n)
    rel_pos = k[None, :] - q[:, None]
    neg = -rel_pos
    half = num_buckets // 2
    ret = (neg < 0).astype(jnp.int32) * half
    n_abs = jnp.abs(neg)
    max_exact = half // 2
    is_small = n_abs < max_exact
    n_safe = jnp.maximum(n_abs, 1).astype(jnp.float32)
    val_if_large = max_exact + (
        jnp.log(n_safe / max_exact)
        / math.log(max_distance / max_exact)
        * (half - max_exact)
    ).astype(jnp.int32)
    val_if_large = jnp.minimum(val_if_large, half - 1)
    bucket = ret + jnp.where(is_small, n_abs, val_if_large)
    values = emb[bucket]                                      # (n, n, heads)
    return jnp.transpose(values, (2, 0, 1))


if __name__ == "__main__":
    heads = 8
    num_buckets = 32
    max_distance = 128

    key = jax.random.PRNGKey(0)
    # nn.Embedding default init: N(0, 1)
    emb = jax.random.normal(key, (num_buckets, heads), dtype=jnp.float32)

    # Case 1: multi-tile grid (n*n = 256 -> two 128-wide lane-dense tiles).
    n = 16
    out = relative_position_bias(
        emb, n, num_buckets=num_buckets, max_distance=max_distance, tile=128
    )
    out = jax.block_until_ready(out)
    ref = _reference(emb, n, num_buckets, max_distance)
    assert out.shape == (heads, n, n), out.shape
    assert jnp.allclose(out, ref, atol=1e-5, rtol=1e-5), "mismatch vs reference (n=16)"

    # Case 2: padded last tile (n*n = 144, not a multiple of the tile width).
    n2 = 12
    out2 = relative_position_bias(
        emb, n2, num_buckets=num_buckets, max_distance=max_distance
    )
    out2 = jax.block_until_ready(out2)
    ref2 = _reference(emb, n2, num_buckets, max_distance)
    assert out2.shape == (heads, n2, n2), out2.shape
    assert jnp.allclose(out2, ref2, atol=1e-5, rtol=1e-5), "mismatch vs reference (n=12)"

    print("KERNEL_OK")
</pallas_src>

<mosaic_0001>
module attributes {stable_mosaic.version = 11 : i64} {
  func.func @_rel_pos_bias_kernel(%arg0: i32, %arg1: memref<8x32xf32, #tpu.memory_space<vmem>>, %arg2: memref<8x128xf32, #tpu.memory_space<vmem>>) attributes {dimension_semantics = [#tpu.dimension_semantics<parallel>], iteration_bounds = array<i64: 2>, scalar_prefetch = 0 : i64, scratch_operands = 0 : i64, tpu.core_type = #tpu.core_type<tc>, window_params = [{pipeline_mode = #tpu.pipeline_mode<synchronous>, transform_indices = @transform_0, window_bounds = array<i64: 8, 32>}, {transform_indices = @transform_1, window_bounds = array<i64: 8, 128>}]} {
    %c128_i32 = arith.constant 128 : i32
    %0 = arith.muli %arg0, %c128_i32 : i32
    %1 = tpu.iota {dimensions = array<i32: 1>} : vector<1x128xi32>
    %2 = vector.broadcast %0 : i32 to vector<1x128xi32>
    %3 = arith.addi %1, %2 : vector<1x128xi32>
    %4 = arith.sitofp %3 : vector<1x128xi32> to vector<1x128xf32>
    %cst = arith.constant 6.250000e-02 : f32
    %5 = vector.broadcast %cst : f32 to vector<1x128xf32>
    %6 = arith.mulf %4, %5 : vector<1x128xf32>
    %7 = arith.fptosi %6 : vector<1x128xf32> to vector<1x128xi32>
    %c16_i32 = arith.constant 16 : i32
    %8 = vector.broadcast %c16_i32 : i32 to vector<1x128xi32>
    %9 = arith.muli %7, %8 : vector<1x128xi32>
    %10 = arith.subi %3, %9 : vector<1x128xi32>
    %c0_i32 = arith.constant 0 : i32
    %11 = vector.broadcast %c0_i32 : i32 to vector<1x128xi32>
    %12 = arith.cmpi slt, %10, %11 : vector<1x128xi32>
    %c-1_i32 = arith.constant -1 : i32
    %c0_i32_0 = arith.constant 0 : i32
    %13 = vector.broadcast %c-1_i32 : i32 to vector<1x128xi32>
    %14 = vector.broadcast %c0_i32_0 : i32 to vector<1x128xi32>
    %15 = arith.select %12, %13, %14 : vector<1x128xi1>, vector<1x128xi32>
    %16 = arith.addi %7, %15 : vector<1x128xi32>
    %c16_i32_1 = arith.constant 16 : i32
    %17 = vector.broadcast %c16_i32_1 : i32 to vector<1x128xi32>
    %18 = arith.cmpi sge, %10, %17 : vector<1x128xi32>
    %c1_i32 = arith.constant 1 : i32
    %c0_i32_2 = arith.constant 0 : i32
    %19 = vector.broadcast %c1_i32 : i32 to vector<1x128xi32>
    %20 = vector.broadcast %c0_i32_2 : i32 to vector<1x128xi32>
    %21 = arith.select %18, %19, %20 : vector<1x128xi1>, vector<1x128xi32>
    %22 = arith.addi %16, %21 : vector<1x128xi32>
    %c16_i32_3 = arith.constant 16 : i32
    %23 = vector.broadcast %c16_i32_3 : i32 to vector<1x128xi32>
    %24 = arith.muli %22, %23 : vector<1x128xi32>
    %25 = arith.subi %3, %24 : vector<1x128xi32>
    %26 = arith.subi %22, %25 : vector<1x128xi32>
    %c0_i32_4 = arith.constant 0 : i32
    %27 = vector.broadcast %c0_i32_4 : i32 to vector<1x128xi32>
    %28 = arith.cmpi slt, %26, %27 : vector<1x128xi32>
    %c16_i32_5 = arith.constant 16 : i32
    %c0_i32_6 = arith.constant 0 : i32
    %29 = vector.broadcast %c16_i32_5 : i32 to vector<1x128xi32>
    %30 = vector.broadcast %c0_i32_6 : i32 to vector<1x128xi32>
    %31 = arith.select %28, %29, %30 : vector<1x128xi1>, vector<1x128xi32>
    %32 = math.absi %26 : vector<1x128xi32>
    %c8_i32 = arith.constant 8 : i32
    %33 = vector.broadcast %c8_i32 : i32 to vector<1x128xi32>
    %34 = arith.cmpi slt, %32, %33 : vector<1x128xi32>
    %c1_i32_7 = arith.constant 1 : i32
    %35 = vector.broadcast %c1_i32_7 : i32 to vector<1x128xi32>
    %36 = arith.maxsi %32, %35 : vector<1x128xi32>
    %37 = arith.sitofp %36 : vector<1x128xi32> to vector<1x128xf32>
    %cst_8 = arith.constant 1.250000e-01 : f32
    %38 = vector.broadcast %cst_8 : f32 to vector<1x128xf32>
    %39 = arith.mulf %37, %38 : vector<1x128xf32>
    %40 = math.log %39 : vector<1x128xf32>
    %cst_9 = arith.constant 2.885390e+00 : f32
    %41 = vector.broadcast %cst_9 : f32 to vector<1x128xf32>
    %42 = arith.mulf %40, %41 : vector<1x128xf32>
    %43 = arith.fptosi %42 : vector<1x128xf32> to vector<1x128xi32>
    %c8_i32_10 = arith.constant 8 : i32
    %44 = vector.broadcast %c8_i32_10 : i32 to vector<1x128xi32>
    %45 = arith.addi %44, %43 : vector<1x128xi32>
    %c15_i32 = arith.constant 15 : i32
    %46 = vector.broadcast %c15_i32 : i32 to vector<1x128xi32>
    %47 = arith.minsi %45, %46 : vector<1x128xi32>
    %48 = arith.select %34, %32, %47 : vector<1x128xi1>, vector<1x128xi32>
    %49 = arith.addi %31, %48 : vector<1x128xi32>
    %50 = tpu.iota {dimensions = array<i32: 0>} : vector<32x128xi32>
    %51 = vector.broadcast %49 : vector<1x128xi32> to vector<32x128xi32>
    %52 = arith.cmpi eq, %51, %50 : vector<32x128xi32>
    %53 = arith.extui %52 : vector<32x128xi1> to vector<32x128xi32>
    %54 = arith.sitofp %53 : vector<32x128xi32> to vector<32x128xf32>
    %c0 = arith.constant 0 : index
    %c0_11 = arith.constant 0 : index
    %55 = vector.load %arg1[%c0, %c0_11] : memref<8x32xf32, #tpu.memory_space<vmem>>, vector<8x32xf32>
    %cst_12 = arith.constant dense<0.000000e+00> : vector<8x128xf32>
    %56 = tpu.matmul %55, %54, %cst_12 {dimension_numbers = #tpu.dot_dimension_numbers<[1], [0], [0], [1], [0, 0, 1, 1], [], []>} : vector<8x32xf32>, vector<32x128xf32>, vector<8x128xf32> -> vector<8x128xf32>
    %c0_13 = arith.constant 0 : index
    %c0_14 = arith.constant 0 : index
    %57 = vector.load %arg2[%c0_13, %c0_14] : memref<8x128xf32, #tpu.memory_space<vmem>>, vector<8x128xf32>
    tpu.vector_store %arg2[%c0_13, %c0_14], %56 {strides = array<i32>} : memref<8x128xf32, #tpu.memory_space<vmem>>, vector<8x128xf32>,
    return
  }
  func.func @transform_0(%arg0: i32) -> (i32, i32) {
    %c0_i32 = arith.constant 0 : i32
    %c0_i32_0 = arith.constant 0 : i32
    %c0_i32_1 = arith.constant 0 : i32
    return %c0_i32, %c0_i32_0 : i32, i32
  }
  func.func @transform_1(%arg0: i32) -> (i32, i32) {
    %c0_i32 = arith.constant 0 : i32
    %c0_i32_0 = arith.constant 0 : i32
    return %c0_i32, %arg0 : i32, i32
  }
}

</mosaic_0001>

<bundles_post_ra>
// kernel: tpu_custom_call.1
= control target key start
LH: loop header
LB: loop body
LE: loop exit
PB: predicated region body
PF: predicated region fallthrough
CT: control target
= control target key end

     0   :  { %6 = vsyncpa [#allocation3], 0  ;;  %s662_s0 = inlined_call_operand.hbm [shape: f32[8,32], index: 0, kind: input, shape index: {}]   ;;  %s663_s1 = inlined_call_operand.hbm [shape: f32[8,256], index: 1, kind: output, shape index: {}]  }
   0x1   :  { %7 = vsyncpa [#allocation4], 0 }
   0x2   :  { %9 = vsyncpa [#allocation4 + $0x1], 0  ;;  %s528_s6 = smov 0   ;;  %s530_s7 = smov 0  }
   0x3   :  { %s532_s8 = smov 0   ;;  %s534_s9 = smov 0  }
   0x4 LB: > { %s549_s10 = sadd.s32 4294967295, %s509_s9   ;;  %s311_s11 = sadd.s32 4294967294, %s509_s9   ;;  %s509_s9 = sphi %s534_s9, %s679_s9   ;;  %s505_s8 = sphi %s532_s8, %s678_s8   ;;  %s501_s7 = sphi %s530_s7, %s677_s7   ;;  %s497_s6 = sphi %s528_s6, %s676_s6  }
   0x5   : > { %s553_s12 = sadd.s32 1, %s509_s9   ;;  %s43_s13 = sadd.s32 1, %s505_s8 }
   0x6   : > { %s40_s14 = ssub.s32 %s509_s9, %s553_s12  ;;  %p53_p0 = scmp.ne.s32.totalorder %s505_s8, %s501_s7 }
   0x7   : > { %p41_p1 = scmp.eq.s32.totalorder %s40_s14, 0  ;;  %p54_p2 = scmp.eq.s32.totalorder %s549_s10, 1 }
   0x8   : > { %p59_p3 = scmp.ne.s32.totalorder %s501_s7, %s497_s6  ;;  %p60_p4 = scmp.eq.s32.totalorder %s311_s11, 1 }
   0x9   : > { %s564_s15 = scalar_select %p41_p1, %s505_s8, %s43_s13  }
   0xa   : > { %p566_p5 = por %p54_p2, %p53_p0  ;;  %p570_p6 = por %p60_p4, %p59_p3 }
   0xb   : > { %p312_p7 = scmp.ge.s32.totalorder %s509_s9, 1  ;;  %p67_p8 = scmp.lt.s32.totalorder %s509_s9, 3 }
   0xc   : > { %s667_s16 = scalar_select %p566_p5, 1, 0 }
   0xd   : > { %s668_s17 = scalar_select %p570_p6, 1, 0 }
   0xe   : > { %p664_p9 = scmp.eq.s32.totalorder %s549_s10, 0  ;;  %p577_p10 = pnand %p312_p7, %p67_p8 }
   0xf   : > { %s511_s19 = smov [#allocation2]   ;;  %s415_s24 = scalar_lea.hbm %s662_s0, 128 }
  0x10   : > { %s669_s18 = scalar_select %p577_p10, 1, 0 }
  0x11   : > { %s80_s20 = sshll.u32 %s511_s19, 4  ;;  %p364_p11 = pneg %p577_p10  ;;  %s81_s20 = int_to_ptr.vmem [resolvable:$true] %s80_s20 }
  0x12   : > { %p416_p13 = scmp.ne.s32.totalorder %s662_s0, %s415_s24  ;;  %p422_p3 = scmp.lt.u32.totalorder %s415_s24, %s662_s0 }
  0x13   : > { %p585_p12 = pnand %p664_p9, %p364_p11 }
  0x15   : > { %p417_p0 = pneg %p585_p12 }
  0x17   : > { %p418_p1 = pnand %p417_p0, %p416_p13 }
  0x19   : > { %p419_p2 = pneg %p418_p1 }
  0x1b   : > { %p424_p4 = pnand %p422_p3, %p419_p2 }
  0x1d   : > { %427 = shalt.err (!%p424_p4)
}
  0x1e   : > { %s428_s29 = scalar_lea.vmem %s81_s20, 128  ;;  %p436_p9 = scmp.lt.s32.totalorder %s81_s20, %s81_s20 }
  0x1f   : > { %p429_p7 = scmp.ne.s32.totalorder %s81_s20, %s428_s29  ;;  %p437_p6 = scmp.lt.s32.totalorder %s428_s29, %s428_s29 }
  0x21   : > { %p431_p8 = pnand %p429_p7, %p417_p0  ;;  %p438_p5 = por %p437_p6, %p436_p9 }
  0x23   : > { %p432_p11 = pneg %p431_p8 }
  0x25   : > { %p439_p10 = pnand %p438_p5, %p432_p11 }
  0x27   : > { %442 = shalt.err (!%p439_p10)
}
  0x28   : > { %367 = dma.hbm_to_vmem [thread:$0]  (!%p585_p12), %s662_s0, 128, %s81_s20, [#allocation3]  }
  0x29   : > { %p671_p13 = scmp.ne.s32.totalorder %s669_s18, 0 }
  0x2a   : > { %p672_p1 = scmp.eq.s32.totalorder (!%p671_p13), %s549_s10, 0 }
  0x2b   : > { %93 = sbr.rel (%p671_p13) target bundleno = 352 (0x160), region = 24 }
  0x32   : > { %488 = dma.done.wait (%p672_p1), [#allocation3], 128   ;;  %p673_p0 = pmov %p672_p1 }
  0x33   : > { %s317_s3 = sshll.u32 %s549_s10, 7  ;;  %v109_v0 = vlaneseq  ;;  %v512_v1 = vmov 0.0|0.0   ;;  %vm513_vm0 = vmmov 0   ;;  %v514_v4 = vmov 0.0   ;;  %v162_v40 = vld [vmem:[#allocation2] sm:$0xff]  ;;  %s105_s4 = sand.u32 1, %s501_s7  }
  0x34   : > { %490 = vsyncadd (%p673_p0), [#allocation3], 4294967168  ;;  %348 = vmatprep.subr.bf16.mxu0 %v512_v1  ;;  %v111_v2 = vstv %s317_s3  ;;  %345 = vmatprep.mubr.msk.f32.mxu0 %vm513_vm0, %v514_v4  ;;  %v515_v12 = vmov 0   ;;  %v516_v39 = vmov 1.0|1.0   ;;  %vm163_vm13 = vcmask 261120   ;;  %s622_s19 = scalar_lea.hbm %s663_s1, %s317_s3 }
  0x35   : > { %v110_v3 = vand.u32 127, %v109_v0  ;;  %v146_v30 = vshrl.u32 %v109_v0, 7  ;;  %s316_s5 = sshll.u32 %s105_s4, 3  ;;  %s239_s20 = scalar_lea.sflag [#allocation4], %s105_s4 }
  0x36   : > { %s107_s11 = scalar_lea.vmem [#allocation5], %s316_s5  ;;  %p674_p6 = scmp.ne.s32.totalorder %s667_s16, 0 }
  0x37   : > { %v112_v5 = vadd.s32 %v111_v2, %v110_v3  ;;  %v147_v34 = vadd.s32 8, %v146_v30  ;;  %v148_v35 = vadd.s32 16, %v146_v30  ;;  %v149_v36 = vadd.s32 24, %v146_v30  ;;  %s252_s13 = sshll.u32 %s107_s11, 4  ;;  %s517_s22 = smov [#allocation5]   ;;  %s615_s13 = int_to_ptr.vmem [resolvable:$true] %s252_s13 }
  0x38   : > { %s443_s21 = scalar_lea.vmem %s615_s13, 128  ;;  %s447_s23 = sshll.u32 %s517_s22, 4  ;;  %s448_s23 = int_to_ptr.vmem [resolvable:$false] %s447_s23 }
  0x39   : > { %v113_v6 = vcvt.s32.f32 %v112_v5  ;;  %p444_p5 = scmp.ne.s32.totalorder %s615_s13, %s443_s21  ;;  %s449_s10 = scalar_lea.vmem %s448_s23, 256 }
  0x3a   : > { %p450_p12 = scmp.lt.s32.totalorder %s615_s13, %s448_s23  ;;  %p451_p2 = scmp.lt.s32.totalorder %s449_s10, %s443_s21 }
  0x3b   : > { %v114_v7 = vmul.f32 0.0625, %v113_v6  ;;  %p445_p9 = pnand %p444_p5, %p674_p6 }
  0x3c   : > { %p452_p3 = por %p451_p2, %p450_p12 }
  0x3d   : > { %v354_v8 = vtrunc.f32 %v114_v7  ;;  %p446_p10 = pneg %p445_p9 }
  0x3f   : > { %v355_v9 = vcvt.f32.s32 %v354_v8  ;;  %p453_p4 = pnand %p452_p3, %p446_p10 }
  0x41   : > { %v116_v10 = vmul.u32 16, %v355_v9 }
  0x43   : > { %v117_v11 = vsub.s32 %v112_v5, %v116_v10 }
  0x45   : > { %vm118_vm1 = vcmp.lt.s32.totalorder %v117_v11, 0  ;;  %vm121_vm2 = vcmp.ge.s32.totalorder %v117_v11, 16 }
  0x46   : > { %v119_v13 = vsel %vm118_vm1, 4294967295, %v515_v12  ;;  %v122_v14 = vsel %vm121_vm2, 1, %v515_v12 }
  0x47   : > { %v120_v15 = vadd.s32 %v355_v9, %v119_v13 }
  0x49   : > { %v123_v16 = vadd.s32 %v122_v14, %v120_v15 }
  0x4b   : > { %v124_v17 = vmul.u32 16, %v123_v16 }
  0x4d   : > { %v125_v18 = vsub.s32 %v112_v5, %v124_v17 }
  0x4f   : > { %v126_v19 = vsub.s32 %v123_v16, %v125_v18 }
  0x51   : > { %v129_v20 = vsub.s32 0, %v126_v19  ;;  %vm127_vm4 = vcmp.lt.s32.totalorder %v126_v19, 0 }
  0x52   : > { %v128_v32 = vsel %vm127_vm4, 16, %v515_v12 }
  0x53   : > { %v318_v21 = vmin.u32 %v129_v20, %v126_v19 }
  0x55   : > { %vm132_vm3 = vcmp.gt.s32.totalorder %v318_v21, 1  ;;  %vm131_vm5 = vcmp.lt.s32.totalorder %v318_v21, 8 }
  0x56   : > { %v133_v22 = vsel %vm132_vm3, %v318_v21, 1 }
  0x57   : > { %v134_v23 = vcvt.s32.f32 %v133_v22 }
  0x59   : > { %v135_v24 = vmul.f32 0.125, %v134_v23 }
  0x5b   : > { %413 = vlog2.f32 %v135_v24 }
  0x65   : > { %v414_v25 = vpop.eup %413 }
  0x66   : > { %v137_v26 = vmul.f32 0.6931472, %v414_v25 }
  0x68   : > { %v138_v27 = vmul.f32 2.88539, %v137_v26 }
  0x6a   : > { %v356_v28 = vtrunc.f32 %v138_v27 }
  0x6c   : > { %v357_v29 = vcvt.f32.s32 %v356_v28 }
  0x6e   : > { %v140_v31 = vadd.s32 8, %v357_v29 }
  0x70   : > { %vm141_vm6 = vcmp.lt.s32.totalorder %v140_v31, 15 }
  0x71   : > { %v142_v33 = vsel %vm141_vm6, %v140_v31, 15 }
  0x72   : > { %v143_v37 = vsel %vm131_vm5, %v318_v21, %v142_v33 }
  0x73   : > { %v144_v38 = vadd.s32 %v143_v37, %v128_v32 }
  0x75   : > { %vm150_vm7 = vcmp.eq.s32.totalorder %v144_v38, %v146_v30  ;;  %vm151_vm8 = vcmp.eq.s32.totalorder %v144_v38, %v147_v34  ;;  %vm152_vm9 = vcmp.eq.s32.totalorder %v144_v38, %v148_v35  ;;  %vm153_vm10 = vcmp.eq.s32.totalorder %v144_v38, %v149_v36 }
  0x76   : > { %vm349_vm11 = vmpackc.low %vm151_vm8, %vm150_vm7 }
  0x77   : > { %350 = vmatpush3.bf16.msk.msra.mxu0 %vm349_vm11, %v516_v39  ;;  %vm352_vm12 = vmpackc.low %vm153_vm10, %vm152_vm9 }
  0x78   : > { %351 = vmatprep.subr.bf16.mxu0 %v512_v1 }
  0x7b   : > { %353 = vmatpush3.bf16.msk.msra.mxu0 %vm352_vm12, %v516_v39 }
  0x7e   : > { %346 = vmatmul.mubr.msk.f32.vlgmr.msra.gmra.mrb[0].mxu0 %vm163_vm13, %v162_v40 }
 0x151   : > { %v233_v41 = vpop.f32.mrb[0].mxu0 }
 0x152   : > { %237 = vst [vmem:[%s107_s11] sm:$0xff] %v233_v41  ;;  %v347_v42 = vpop.f32.mrb[1].mxu0 }
 0x153   : > { %456 = shalt.err (!%p453_p4)
}
 0x154   : > { %s457_s24 = scalar_lea.hbm %s622_s19, 128  ;;  %s461_s27 = scalar_lea.hbm %s663_s1, 256 }
 0x155   : > { %p458_p7 = scmp.ne.s32.totalorder %s622_s19, %s457_s24  ;;  %p462_p13 = scmp.lt.u32.totalorder %s622_s19, %s663_s1 }
 0x156   : > { %p463_p1 = scmp.lt.u32.totalorder %s461_s27, %s457_s24  ;;  %p465_p5 = scmp.lt.u32.totalorder %s457_s24, %s622_s19 }
 0x157   : > { %p459_p8 = pnand %p458_p7, %p674_p6 }
 0x158   : > { %p464_p0 = por %p463_p1, %p462_p13 }
 0x159   : > { %p460_p11 = pneg %p459_p8 }
 0x15a   : > { %p466_p9 = por %p465_p5, %p464_p0 }
 0x15c   : > { %p467_p10 = pnand %p466_p9, %p460_p11 }
 0x15e   : > { %470 = shalt.err (!%p467_p10)
}
 0x15f   : > { %362 = dma.vmem_to_hbm [thread:$0]  (%p674_p6), %s615_s13, 128, %s622_s19, %s239_s20  }
 0x160 PF: > { %p374_p12 = scmp.ge.s32.totalorder %s509_s9, 2  ;;  %s264_s30 = sand.u32 1, %s497_s6  }
 0x161   : > { %p675_p2 = scmp.ne.s32.totalorder %s668_s17, 0  ;;  %s265_s2 = scalar_lea.sflag [#allocation4], %s264_s30 }
 0x163   : > { %p369_p3 = pnand %p374_p12, %p675_p2 }
 0x165   : > { %492 = dma.done.wait (!%p369_p3), %s265_s2, 128  }
 0x166   : > { %494 = vsyncadd (!%p369_p3), %s265_s2, 4294967168  ;;  %p12_p4 = scmp.ge.s32.totalorder %s553_s12, 4   ;;  %s676_s6 = smov %s501_s7 }
 0x167   : > { %s677_s7 = smov %s505_s8  ;;  %s678_s8 = smov %s564_s15 }
 0x168   : > { %s679_s9 = smov %s553_s12  ;;  %14 = sbr.rel (!%p12_p4) target bundleno = 4 (0x4), region = 61 }
 0x16f   :  { %270 = vsyncpa [#allocation3], 1 }
 0x170   :  { %272 = vsyncpa [#allocation3 + $0x1], 1 }
 0x171   :  { %273 = vsyncpa [#allocation4], 1 }
 0x172   :  { %275 = vsyncpa [#allocation4 + $0x1], 1 }

</bundles_post_ra>
